<compile_context>
chip_gen: v5e
topology: v5e:2x2
jax: 0.10.0
libtpu: 0.0.40
codegen_flags: <defaults>
</compile_context>

<pallas_src>
import functools

import jax
import jax.numpy as jnp
from jax.experimental import pallas as pl
from jax.experimental.pallas import tpu as pltpu


def _round_up(x, m):
    return (x + m - 1) // m * m


def _ldam_kernel(x_ref, w_ref, invw_ref, o_ref, *, operand_dtype):
    # x_ref:    (TM, D)  raw feature tile (streamed over the batch grid)
    # w_ref:    (D, Cp)  full weight matrix (resident: same block every step)
    # invw_ref: (1, Cp)  reciprocal column norms of W (resident)
    # o_ref:    (TM, Cp) cosine-similarity output tile
    x = x_ref[...]
    w = w_ref[...]

    # Per-row reciprocal norms of the x tile: only TM scalars.
    # rsqrt runs on the EUP slot; max(ss, 1e-24) == max(norm, 1e-12) after sqrt,
    # matching F.normalize's eps handling.
    x_sq = jnp.sum(x * x, axis=1, keepdims=True)            # (TM, 1)
    inv_xnorm = jax.lax.rsqrt(jnp.maximum(x_sq, 1e-24))     # (TM, 1)

    # Raw matmul on the MXU (f32 accumulation), then post-scale by the outer
    # product of reciprocal norms: TM*Cp + TM elementwise ops instead of
    # TM*D + D*Cp pre-normalization ops.
    acc = jnp.dot(
        x.astype(operand_dtype),
        w.astype(operand_dtype),
        preferred_element_type=jnp.float32,
    )
    o_ref[...] = (acc * inv_xnorm * invw_ref[...]).astype(o_ref.dtype)


@functools.partial(jax.jit, static_argnames=("block_rows", "use_bf16_matmul"))
def classifier_ldam_forward(x, weight, *, block_rows=512, use_bf16_matmul=False):
    """y = normalize(x, dim=1) @ normalize(weight, dim=0).

    block_rows: row-tile size TM (multiple of 8).  Default 512 keeps
      2*(TM*D + TM*Cp)*4B + 2*D*Cp*4B under the 32 MiB default scoped VMEM for
      typical D/C; shrink it (or raise vmem_limit_bytes) on v7x (64 MiB phys).
    use_bf16_matmul: cast MXU operands to bf16 (f32 accumulate) on v6e/v7x if
      the cosine-similarity tolerance allows (~1e-3 relative error).
    """
    B, D = x.shape
    D2, C = weight.shape
    assert D == D2

    # Lane-dense output: pad the class dim to a multiple of 128.  Zero columns
    # are harmless: raw matmul gives 0, and 0 * (1/max(0, eps)) == 0.
    Cp = _round_up(C, 128)
    if Cp != C:
        weight = jnp.pad(weight, ((0, 0), (0, Cp - C)))

    # Reciprocal column norms of W, computed ONCE per call (not per grid step).
    w_colnorm = jnp.sqrt(jnp.sum(weight * weight, axis=0, keepdims=True))
    inv_wnorm = 1.0 / jnp.maximum(w_colnorm, 1e-12)          # (1, Cp) f32

    # Batch tiling: TM is a multiple of 8; pad B up to a multiple of TM so
    # every grid step is a full tile.  Zero pad rows normalize to zero rows.
    tm = min(int(block_rows), _round_up(B, 8))
    tm = _round_up(tm, 8)
    Bp = _round_up(B, tm)
    if Bp != B:
        x = jnp.pad(x, ((0, Bp - B), (0, 0)))

    operand_dtype = jnp.bfloat16 if use_bf16_matmul else jnp.float32

    out = pl.pallas_call(
        functools.partial(_ldam_kernel, operand_dtype=operand_dtype),
        out_shape=jax.ShapeDtypeStruct((Bp, Cp), jnp.float32),
        grid_spec=pltpu.PrefetchScalarGridSpec(
            num_scalar_prefetch=0,
            grid=(Bp // tm,),
            in_specs=[
                pl.BlockSpec((tm, D), lambda i: (i, 0)),   # x: streamed tiles
                pl.BlockSpec((D, Cp), lambda i: (0, 0)),   # W: resident
                pl.BlockSpec((1, Cp), lambda i: (0, 0)),   # inv_wnorm: resident
            ],
            out_specs=pl.BlockSpec((tm, Cp), lambda i: (i, 0)),
        ),
        compiler_params=pltpu.CompilerParams(
            # Batch rows are independent -> shard across TCs on v7x megacore.
            dimension_semantics=("parallel",),
        ),
    )(x, weight.astype(jnp.float32), inv_wnorm)

    return out[:B, :C]


def init_ldam_weight(key, feat_dim, num_classes):
    """Replicates: uniform_(-1, 1); renorm_(2, 1, 1e-5); mul_(1e5)."""
    w = jax.random.uniform(key, (feat_dim, num_classes), jnp.float32, -1.0, 1.0)
    col_norm = jnp.sqrt(jnp.sum(w * w, axis=0, keepdims=True))
    maxnorm = 1e-5
    # torch.renorm: scale columns whose norm exceeds maxnorm down to maxnorm.
    scale = jnp.where(col_norm > maxnorm, maxnorm / (col_norm + 1e-7), 1.0)
    w = w * scale
    w = w * 1e5
    return w


if __name__ == "__main__":
    key = jax.random.PRNGKey(0)
    kx, kw = jax.random.split(key)

    # Small demo shapes (production sizes would use the same wrapper; a plain
    # jnp fallback below a size threshold would avoid kernel-launch overhead
    # at toy sizes, but here we exercise the Pallas path directly).
    B, feat_dim, num_classes = 8, 32, 16
    x = jax.random.normal(kx, (B, feat_dim), jnp.float32)
    weight = init_ldam_weight(kw, feat_dim, num_classes)

    y = classifier_ldam_forward(x, weight)
    y = jax.block_until_ready(y)

    # Pure-JAX reference check (exact F.normalize semantics).
    xn_ref = x / jnp.maximum(
        jnp.sqrt(jnp.sum(x * x, axis=1, keepdims=True)), 1e-12)
    wn_ref = weight / jnp.maximum(
        jnp.sqrt(jnp.sum(weight * weight, axis=0, keepdims=True)), 1e-12)
    y_ref = xn_ref @ wn_ref

    assert y.shape == (B, num_classes)
    assert jnp.allclose(y, y_ref, atol=1e-4, rtol=1e-4), (
        float(jnp.max(jnp.abs(y - y_ref))))

    print("KERNEL_OK")
</pallas_src>

<mosaic_0001>
module attributes {stable_mosaic.version = 11 : i64} {
  func.func @_ldam_kernel(%arg0: i32, %arg1: memref<8x32xf32, #tpu.memory_space<vmem>>, %arg2: memref<32x128xf32, #tpu.memory_space<vmem>>, %arg3: memref<1x128xf32, #tpu.memory_space<vmem>>, %arg4: memref<8x128xf32, #tpu.memory_space<vmem>>) attributes {dimension_semantics = [#tpu.dimension_semantics<parallel>], iteration_bounds = array<i64: 1>, scalar_prefetch = 0 : i64, scratch_operands = 0 : i64, tpu.core_type = #tpu.core_type<tc>, window_params = [{transform_indices = @transform_0, window_bounds = array<i64: 8, 32>}, {pipeline_mode = #tpu.pipeline_mode<synchronous>, transform_indices = @transform_1, window_bounds = array<i64: 32, 128>}, {pipeline_mode = #tpu.pipeline_mode<synchronous>, transform_indices = @transform_2, window_bounds = array<i64: 1, 128>}, {transform_indices = @transform_3, window_bounds = array<i64: 8, 128>}]} {
    %c0 = arith.constant 0 : index
    %c0_0 = arith.constant 0 : index
    %0 = vector.load %arg1[%c0, %c0_0] : memref<8x32xf32, #tpu.memory_space<vmem>>, vector<8x32xf32>
    %c0_1 = arith.constant 0 : index
    %c0_2 = arith.constant 0 : index
    %1 = vector.load %arg2[%c0_1, %c0_2] : memref<32x128xf32, #tpu.memory_space<vmem>>, vector<32x128xf32>
    %2 = arith.mulf %0, %0 : vector<8x32xf32>
    %cst = arith.constant dense<0.000000e+00> : vector<8xf32>
    %3 = vector.multi_reduction <add>, %2, %cst [1] : vector<8x32xf32> to vector<8xf32>
    %4 = vector.shape_cast %3 : vector<8xf32> to vector<8x1xf32>
    %cst_3 = arith.constant 1.000000e-24 : f32
    %5 = vector.broadcast %cst_3 : f32 to vector<8x1xf32>
    %6 = arith.maximumf %4, %5 : vector<8x1xf32>
    %7 = math.rsqrt %6 : vector<8x1xf32>
    %cst_4 = arith.constant dense<0.000000e+00> : vector<8x128xf32>
    %8 = tpu.matmul %0, %1, %cst_4 {dimension_numbers = #tpu.dot_dimension_numbers<[1], [0], [0], [1], [0, 0, 1, 1], [], []>} : vector<8x32xf32>, vector<32x128xf32>, vector<8x128xf32> -> vector<8x128xf32>
    %9 = vector.broadcast %7 : vector<8x1xf32> to vector<8x128xf32>
    %10 = arith.mulf %8, %9 : vector<8x128xf32>
    %c0_5 = arith.constant 0 : index
    %c0_6 = arith.constant 0 : index
    %11 = vector.load %arg3[%c0_5, %c0_6] : memref<1x128xf32, #tpu.memory_space<vmem>>, vector<1x128xf32>
    %12 = vector.broadcast %11 : vector<1x128xf32> to vector<8x128xf32>
    %13 = arith.mulf %10, %12 : vector<8x128xf32>
    %c0_7 = arith.constant 0 : index
    %c0_8 = arith.constant 0 : index
    %14 = vector.load %arg4[%c0_7, %c0_8] : memref<8x128xf32, #tpu.memory_space<vmem>>, vector<8x128xf32>
    tpu.vector_store %arg4[%c0_7, %c0_8], %13 {strides = array<i32>} : memref<8x128xf32, #tpu.memory_space<vmem>>, vector<8x128xf32>,
    return
  }
  func.func @transform_0(%arg0: i32) -> (i32, i32) {
    %c0_i32 = arith.constant 0 : i32
    %c0_i32_0 = arith.constant 0 : i32
    return %arg0, %c0_i32 : i32, i32
  }
  func.func @transform_1(%arg0: i32) -> (i32, i32) {
    %c0_i32 = arith.constant 0 : i32
    %c0_i32_0 = arith.constant 0 : i32
    %c0_i32_1 = arith.constant 0 : i32
    return %c0_i32, %c0_i32_0 : i32, i32
  }
  func.func @transform_2(%arg0: i32) -> (i32, i32) {
    %c0_i32 = arith.constant 0 : i32
    %c0_i32_0 = arith.constant 0 : i32
    %c0_i32_1 = arith.constant 0 : i32
    return %c0_i32, %c0_i32_0 : i32, i32
  }
  func.func @transform_3(%arg0: i32) -> (i32, i32) {
    %c0_i32 = arith.constant 0 : i32
    %c0_i32_0 = arith.constant 0 : i32
    return %arg0, %c0_i32 : i32, i32
  }
}

</mosaic_0001>

<bundles_post_ra>
// kernel: classifier_ldam_forward.1
= control target key start
LH: loop header
LB: loop body
LE: loop exit
PB: predicated region body
PF: predicated region fallthrough
CT: control target
= control target key end

     0   :  { %vm21_vm0 = vcmask 261120   ;;  %s155_s0 = inlined_call_operand.vmem [shape: f32[8,32], index: 0, kind: input, shape index: {}]   ;;  %s156_s1 = inlined_call_operand.vmem [shape: f32[32,128], index: 1, kind: input, shape index: {}]   ;;  %s157_s2 = inlined_call_operand.vmem [shape: f32[1,128], index: 2, kind: input, shape index: {}]   ;;  %s158_s3 = inlined_call_operand.hbm [shape: f32[8,128], index: 3, kind: output, shape index: {}]  }
   0x1   :  { %v15_v0 = vld [vmem:[%s155_s0] sm:$0xff]  ;;  %v19_v1 = vld [vmem:[%s156_s1 + $0x18] sm:$0xff]  ;;  %v18_v2 = vld [vmem:[%s156_s1 + $0x10] sm:$0xff] }
   0x2   :  { %v20_v3 = vmul.f32 %v15_v0, %v15_v0  ;;  %51 = vmatpush.msra.mxu0 %v19_v1  ;;  %v17_v4 = vld [vmem:[%s156_s1 + $0x8] sm:$0xff] }
   0x3   :  { %8 = vsyncpa [#allocation3], 0  ;;  %v16_v6 = vld [vmem:[%s156_s1] sm:$0xff]  ;;  %s113_s1 = smov [#allocation2]   ;;  %s73_s26 = sshll.u32 %s158_s3, 4  ;;  %s74_s26 = int_to_ptr.hbm [resolvable:$true] %s73_s26 }
   0x4   :  { %v22_v5 = vsel %vm21_vm0, %v20_v3, 0.0  ;;  %52 = vmatpush.msra.mxu0 %v18_v2  ;;  %v84_v16 = vld [vmem:[%s157_s2] ss:$0 sm:$0xff]  ;;  %s71_s23 = sshll.u32 %s113_s1, 4  ;;  %s72_s23 = int_to_ptr.vmem [resolvable:$true] %s71_s23 }
   0x5   :  { %23 = vadd.xlane.f32.xlu0 %v22_v5 }
   0x6   :  { %53 = vmatpush.msra.mxu0 %v17_v4 }
   0x8   :  { %54 = vmatpush.msra.mxu0 %v16_v6 }
   0x9   :  { %82 = vmatmul.msk.f32.vlgmr.msra.gmra.mxu0 %vm21_vm0, %v15_v0 }
  0x78   :  { %v24_v7 = vpop.xlane.xlu0 %23 }
  0x79   :  { %v25_v8 = vmax.f32 %v24_v7, 1e-24 }
  0x7b   :  { %85 = vrsqrt.f32 %v25_v8  ;;  %vm32_vm2 = vweird.f32 %v25_v8 }
  0x81   :  { %v86_v9 = vpop.eup %85 }
  0x82   :  { %v27_v10 = vmul.f32 %v86_v9, %v25_v8  ;;  %vm33_vm1 = vweird.f32 %v86_v9 }
  0x83   :  { %vm34_vm3 = vmor %vm32_vm2, %vm33_vm1 }
  0x84   :  { %v28_v11 = vmul.f32 %v86_v9, %v27_v10 }
  0x86   :  { %v29_v12 = vmul.f32 0.5, %v28_v11  ;;  %v56_v15 = vpop.f32.mrf.mxu0 }
  0x88   :  { %v30_v13 = vsub.f32 1.5, %v29_v12 }
  0x8a   :  { %v31_v14 = vmul.f32 %v86_v9, %v30_v13 }
  0x8c   :  { %v35_v17 = vsel %vm34_vm3, %v86_v9, %v31_v14 }
  0x8d   :  { %v59_v18 = vmul.f32 %v56_v15, %v35_v17 }
  0x8f   :  { %v64_v19 = vmul.f32 %v84_v16, %v59_v18 }
  0x91   :  { %65 = vst [vmem:[#allocation2] sm:$0xff] %v64_v19 }
  0x92   :  { %76 = dma.vmem_to_hbm [thread:$0]  %s72_s23, 128, %s74_s26, [#allocation3]  }
  0x93   :  { %111 = dma.done.wait [#allocation3], 128  }
  0x94   :  { %112 = vsyncadd [#allocation3], 4294967168 }
  0x95   :  { %81 = vsyncpa [#allocation3], 1 }

</bundles_post_ra>
